<compile_context>
chip_gen: v7x
topology: tpu7x:2x2x1
jax: 0.10.0
libtpu: 0.0.40
codegen_flags: <defaults>
</compile_context>

<pallas_src>
import functools

import jax
import jax.numpy as jnp
from jax.experimental import pallas as pl
from jax.experimental.pallas import tpu as pltpu


def _softmax_body_kernel(x_ref, g_ref, actions_ref, *, T, num_actions):
    """One batch tile: x_ref (TB, A) logits, g_ref (TB, A) Gumbel noise."""
    TB, A = x_ref.shape

    # Perturbed (unnormalized) log-probs.  Adding the per-row softmax constant
    # (-max - log(sum(exp))) cannot change which indices are top-2, so it is
    # omitted entirely — the sampling distribution is identical.
    z = x_ref[...].astype(jnp.float32) * jnp.float32(T) + g_ref[...]

    iota = jax.lax.broadcasted_iota(jnp.int32, (TB, A), 1)
    big = jnp.int32(num_actions)

    # --- top-1 -----------------------------------------------------------
    max1 = jnp.max(z, axis=-1, keepdims=True)
    idx1 = jnp.min(jnp.where(z == max1, iota, big), axis=-1, keepdims=True)  # (TB, 1)

    # --- top-2 (mask out the first pick) ---------------------------------
    z2 = jnp.where(iota == idx1, -jnp.inf, z)
    max2 = jnp.max(z2, axis=-1, keepdims=True)
    idx2 = jnp.min(jnp.where(z2 == max2, iota, big), axis=-1, keepdims=True)  # (TB, 1)

    # --- assemble (TB, 2) result without concatenate ----------------------
    col = jax.lax.broadcasted_iota(jnp.int32, (TB, 2), 1)
    actions_ref[...] = jnp.where(col == 0, idx1, idx2).astype(jnp.int32)


def _pick_batch_tile(B):
    """Largest batch tile (<= 512 rows) that evenly divides B.

    512 rows x A f32, double-buffered for two inputs, stays far below the
    scoped-VMEM defaults on v5e (16 MiB), v6e (32 MiB) and v7x (32/64 MiB),
    while being large enough to sit near the HBM roofline.
    """
    if B <= 512:
        return B
    for tb in (512, 256, 128, 64, 32, 16, 8):
        if B % tb == 0:
            return tb
    return B  # fallback: single block


def softmax_body(outputs, key, T=7.0):
    """outputs: (B, A) float32 logits; key: jax PRNG key.

    Returns (B, 2) int32 actions sampled without replacement from
    softmax(outputs * T)  (torch returns int64; callers must not rely on that).
    """
    B, A = outputs.shape
    # Gumbel(0, 1) noise, one draw per (row, action).
    gumbel = jax.random.gumbel(key, (B, A), dtype=jnp.float32)

    TB = _pick_batch_tile(B)
    grid = (B // TB,)

    kernel = functools.partial(_softmax_body_kernel, T=float(T), num_actions=A)
    return pl.pallas_call(
        kernel,
        out_shape=jax.ShapeDtypeStruct((B, 2), jnp.int32),
        grid_spec=pltpu.PrefetchScalarGridSpec(
            num_scalar_prefetch=0,
            grid=grid,
            in_specs=[
                pl.BlockSpec((TB, A), lambda i: (i, 0)),   # logits tile
                pl.BlockSpec((TB, A), lambda i: (i, 0)),   # gumbel tile
            ],
            out_specs=pl.BlockSpec((TB, 2), lambda i: (i, 0)),
        ),
        compiler_params=pltpu.CompilerParams(
            # Batch tiles are independent -> megacore sharding on v7x; neutral
            # on v5e/v6e.
            dimension_semantics=("parallel",),
        ),
    )(outputs, gumbel)


if __name__ == "__main__":
    key = jax.random.PRNGKey(0)
    k_x, k_noise = jax.random.split(key)

    B, A = 2, 16                       # batch of 2 states, 16 possible actions
    outputs = jax.random.normal(k_x, (B, A), dtype=jnp.float32)

    actions = softmax_body(outputs, k_noise, T=7.0)
    actions = jax.block_until_ready(actions)

    assert actions.shape == (B, 2)
    assert actions.dtype == jnp.int32
    # sampled indices are valid and distinct per row (without replacement)
    assert bool(jnp.all((actions >= 0) & (actions < A)))
    assert bool(jnp.all(actions[:, 0] != actions[:, 1]))

    print("KERNEL_OK")
</pallas_src>

<mosaic_0001>
module attributes {stable_mosaic.version = 11 : i64} {
  func.func @_softmax_body_kernel(%arg0: i32, %arg1: memref<2x16xf32, #tpu.memory_space<vmem>>, %arg2: memref<2x16xf32, #tpu.memory_space<vmem>>, %arg3: memref<2x2xi32, #tpu.memory_space<vmem>>) attributes {dimension_semantics = [#tpu.dimension_semantics<parallel>], iteration_bounds = array<i64: 1>, scalar_prefetch = 0 : i64, scratch_operands = 0 : i64, tpu.core_type = #tpu.core_type<tc>, window_params = [{transform_indices = @transform_0, window_bounds = array<i64: 2, 16>}, {transform_indices = @transform_1, window_bounds = array<i64: 2, 16>}, {transform_indices = @transform_2, window_bounds = array<i64: 2, 2>}]} {
    %c0 = arith.constant 0 : index
    %c0_0 = arith.constant 0 : index
    %0 = vector.load %arg1[%c0, %c0_0] : memref<2x16xf32, #tpu.memory_space<vmem>>, vector<2x16xf32>
    %cst = arith.constant 7.000000e+00 : f32
    %1 = vector.broadcast %cst : f32 to vector<2x16xf32>
    %2 = arith.mulf %0, %1 : vector<2x16xf32>
    %c0_1 = arith.constant 0 : index
    %c0_2 = arith.constant 0 : index
    %3 = vector.load %arg2[%c0_1, %c0_2] : memref<2x16xf32, #tpu.memory_space<vmem>>, vector<2x16xf32>
    %4 = arith.addf %2, %3 : vector<2x16xf32>
    %5 = tpu.iota {dimensions = array<i32: 1>} : vector<2x16xi32>
    %cst_3 = arith.constant dense<0xFF800000> : vector<2xf32>
    %6 = vector.multi_reduction <maximumf>, %4, %cst_3 [1] : vector<2x16xf32> to vector<2xf32>
    %7 = vector.shape_cast %6 : vector<2xf32> to vector<2x1xf32>
    %8 = vector.broadcast %7 : vector<2x1xf32> to vector<2x16xf32>
    %9 = arith.cmpf oeq, %4, %8 : vector<2x16xf32>
    %c16_i32 = arith.constant 16 : i32
    %10 = vector.broadcast %c16_i32 : i32 to vector<2x16xi32>
    %11 = arith.select %9, %5, %10 : vector<2x16xi1>, vector<2x16xi32>
    %cst_4 = arith.constant dense<2147483647> : vector<2xi32>
    %12 = vector.multi_reduction <minsi>, %11, %cst_4 [1] : vector<2x16xi32> to vector<2xi32>
    %13 = vector.shape_cast %12 : vector<2xi32> to vector<2x1xi32>
    %14 = vector.broadcast %13 : vector<2x1xi32> to vector<2x16xi32>
    %15 = arith.cmpi eq, %5, %14 : vector<2x16xi32>
    %cst_5 = arith.constant 0xFF800000 : f32
    %16 = vector.broadcast %cst_5 : f32 to vector<2x16xf32>
    %17 = arith.select %15, %16, %4 : vector<2x16xi1>, vector<2x16xf32>
    %cst_6 = arith.constant dense<0xFF800000> : vector<2xf32>
    %18 = vector.multi_reduction <maximumf>, %17, %cst_6 [1] : vector<2x16xf32> to vector<2xf32>
    %19 = vector.shape_cast %18 : vector<2xf32> to vector<2x1xf32>
    %20 = vector.broadcast %19 : vector<2x1xf32> to vector<2x16xf32>
    %21 = arith.cmpf oeq, %17, %20 : vector<2x16xf32>
    %c16_i32_7 = arith.constant 16 : i32
    %22 = vector.broadcast %c16_i32_7 : i32 to vector<2x16xi32>
    %23 = arith.select %21, %5, %22 : vector<2x16xi1>, vector<2x16xi32>
    %cst_8 = arith.constant dense<2147483647> : vector<2xi32>
    %24 = vector.multi_reduction <minsi>, %23, %cst_8 [1] : vector<2x16xi32> to vector<2xi32>
    %25 = vector.shape_cast %24 : vector<2xi32> to vector<2x1xi32>
    %26 = tpu.iota {dimensions = array<i32: 1>} : vector<2x2xi32>
    %c0_i32 = arith.constant 0 : i32
    %27 = vector.broadcast %c0_i32 : i32 to vector<2x2xi32>
    %28 = arith.cmpi eq, %26, %27 : vector<2x2xi32>
    %29 = vector.shape_cast %13 : vector<2x1xi32> to vector<2x1xi32>
    %30 = vector.broadcast %29 : vector<2x1xi32> to vector<2x2xi32>
    %31 = vector.shape_cast %25 : vector<2x1xi32> to vector<2x1xi32>
    %32 = vector.broadcast %31 : vector<2x1xi32> to vector<2x2xi32>
    %33 = arith.select %28, %30, %32 : vector<2x2xi1>, vector<2x2xi32>
    %c0_9 = arith.constant 0 : index
    %c0_10 = arith.constant 0 : index
    %34 = vector.load %arg3[%c0_9, %c0_10] : memref<2x2xi32, #tpu.memory_space<vmem>>, vector<2x2xi32>
    tpu.vector_store %arg3[%c0_9, %c0_10], %33 {strides = array<i32>} : memref<2x2xi32, #tpu.memory_space<vmem>>, vector<2x2xi32>,
    return
  }
  func.func @transform_0(%arg0: i32) -> (i32, i32) {
    %c0_i32 = arith.constant 0 : i32
    %c0_i32_0 = arith.constant 0 : i32
    return %arg0, %c0_i32 : i32, i32
  }
  func.func @transform_1(%arg0: i32) -> (i32, i32) {
    %c0_i32 = arith.constant 0 : i32
    %c0_i32_0 = arith.constant 0 : i32
    return %arg0, %c0_i32 : i32, i32
  }
  func.func @transform_2(%arg0: i32) -> (i32, i32) {
    %c0_i32 = arith.constant 0 : i32
    %c0_i32_0 = arith.constant 0 : i32
    return %arg0, %c0_i32 : i32, i32
  }
}

</mosaic_0001>

<bundles_post_ra>
// kernel: tpu_custom_call.1
= control target key start
LH: loop header
LB: loop body
LE: loop exit
PB: predicated region body
PF: predicated region fallthrough
CT: control target
= control target key end

     0   :  { %7 = vsyncpa [#allocation3], 0  ;;  %s190_s0 = inlined_call_operand.hbm [shape: f32[2,16], index: 0, kind: input, shape index: {}]   ;;  %s191_s1 = inlined_call_operand.vmem [shape: f32[2,16], index: 1, kind: input, shape index: {}]   ;;  %s192_s2 = inlined_call_operand.hbm [shape: s32[2,2], index: 2, kind: output, shape index: {}]  }
   0x1   :  { %8 = vsyncpa [#allocation4], 0  ;;  %s142_s9 = smov [#allocation2]   ;;  %s94_s13 = scalar_lea.hbm %s190_s0, 32 }
   0x2   :  { %s15_s10 = sshll.u32 %s142_s9, 4  ;;  %p95_p0 = scmp.ne.s32.totalorder %s190_s0, %s94_s13  ;;  %s16_s10 = int_to_ptr.vmem [resolvable:$true] %s15_s10 }
   0x3   :  { %p98_p1 = scmp.lt.u32.totalorder %s94_s13, %s190_s0 }
   0x5   :  { %p100_p2 = pnand %p98_p1, %p95_p0 }
   0x7   :  { %103 = shalt.err (!%p100_p2)
}
   0x8   :  { %s104_s18 = scalar_lea.vmem %s16_s10, 32  ;;  %p109_p4 = scmp.lt.s32.totalorder %s16_s10, %s16_s10 }
   0x9   :  { %p105_p3 = scmp.ne.s32.totalorder %s16_s10, %s104_s18  ;;  %p110_p5 = scmp.lt.s32.totalorder %s104_s18, %s104_s18 }
   0xb   :  { %p111_p6 = por %p110_p5, %p109_p4 }
   0xd   :  { %p112_p7 = pnand %p111_p6, %p105_p3 }
   0xf   :  { %115 = shalt.err (!%p112_p7)
}
  0x10   :  { %18 = dma.hbm_to_vmem [thread:$0]  %s190_s0, 32, %s16_s10, [#allocation3]  }
  0x11   :  { %138 = dma.done.wait [#allocation3], 32  }
  0x12   :  { %139 = vsyncadd [#allocation3], 4294967264  ;;  %v24_v0 = vld [vmem:[#allocation2] sm:$0x3]  ;;  %vm30_vm0 = vcmask 123904   ;;  %v28_v5 = vlaneseq  ;;  %s143_s0 = smov [#allocation5]  }
  0x13   :  { %v26_v1 = vld [vmem:[%s191_s1] sm:$0x3]  ;;  %v25_v2 = vmul.f32 7.0, %v24_v0  ;;  %s83_s1 = sshll.u32 %s143_s0, 4  ;;  %vm75_vm7 = vcmask 9216   ;;  %s84_s1 = int_to_ptr.vmem [resolvable:$true] %s83_s1 }
  0x14   :  { %v29_v6 = vand.u32 127, %v28_v5  ;;  %s116_s23 = scalar_lea.vmem %s84_s1, 32  ;;  %p121_p9 = scmp.lt.s32.totalorder %s84_s1, %s84_s1 }
  0x15   :  { %v27_v3 = vadd.f32 %v26_v1, %v25_v2  ;;  %p117_p8 = scmp.ne.s32.totalorder %s84_s1, %s116_s23  ;;  %p122_p10 = scmp.lt.s32.totalorder %s116_s23, %s116_s23 }
  0x16   :  { %vm73_vm6 = vcmp.eq.s32.totalorder %v29_v6, 0 }
  0x17   :  { %v31_v4 = vsel %vm30_vm0, %v27_v3, -inf  ;;  %p123_p11 = por %p122_p10, %p121_p9 }
  0x18   :  { %32 = vmax.xlane.f32.xlu0 %v31_v4 }
  0x19   :  { %p124_p12 = pnand %p123_p11, %p117_p8 }
  0xa5   :  { %v33_v7 = vpop.xlane.xlu0 %32 }
  0xa6   :  { %vm34_vm1 = vcmp.eq.f32.partialorder %v27_v3, %v33_v7 }
  0xa7   :  { %v35_v8 = vsel %vm34_vm1, %v29_v6, 16 }
  0xa8   :  { %v36_v9 = vsel %vm30_vm0, %v35_v8, 2147483647 }
  0xa9   :  { %v38_v10 = vshra.s32 %v36_v9, 16  ;;  %v37_v12 = vand.u32 65535, %v36_v9 }
  0xab   :  { %v40_v11 = vcvt.s32.f32 %v38_v10  ;;  %v39_v14 = vcvt.s32.f32 %v37_v12 }
  0xad   :  { %41 = vmin.xlane.f32.xlu0 %v40_v11 }
 0x13a   :  { %v42_v13 = vpop.xlane.xlu0 %41 }
 0x13b   :  { %vm43_vm2 = vcmp.eq.f32.partialorder %v40_v11, %v42_v13  ;;  %v48_v16 = vcvt.f32.s32 %v42_v13 }
 0x13c   :  { %v44_v15 = vsel %vm43_vm2, %v39_v14, inf }
 0x13d   :  { %45 = vmin.xlane.f32.xlu1 %v44_v15  ;;  %v49_v18 = vshll.u32 %v48_v16, 16 }
 0x1ca   :  { %v46_v17 = vpop.xlane.xlu1 %45 }
 0x1cb   :  { %v47_v19 = vcvt.f32.s32 %v46_v17 }
 0x1cd   :  { %v50_v20 = vadd.s32 %v49_v18, %v47_v19 }
 0x1cf   :  { %vm51_vm3 = vcmp.eq.s32.totalorder %v29_v6, %v50_v20 }
 0x1d0   :  { %v52_v21 = vsel %vm51_vm3, -inf, %v27_v3 }
 0x1d1   :  { %v53_v22 = vsel %vm30_vm0, %v52_v21, -inf }
 0x1d2   :  { %54 = vmax.xlane.f32.xlu1 %v53_v22 }
 0x25f   :  { %v55_v23 = vpop.xlane.xlu1 %54 }
 0x260   :  { %vm56_vm4 = vcmp.eq.f32.partialorder %v52_v21, %v55_v23 }
 0x261   :  { %v57_v24 = vsel %vm56_vm4, %v29_v6, 16 }
 0x262   :  { %v58_v25 = vsel %vm30_vm0, %v57_v24, 2147483647 }
 0x263   :  { %v60_v26 = vshra.s32 %v58_v25, 16  ;;  %v59_v28 = vand.u32 65535, %v58_v25 }
 0x265   :  { %v62_v27 = vcvt.s32.f32 %v60_v26  ;;  %v61_v30 = vcvt.s32.f32 %v59_v28 }
 0x267   :  { %63 = vmin.xlane.f32.xlu0 %v62_v27 }
 0x2f4   :  { %v64_v29 = vpop.xlane.xlu0 %63 }
 0x2f5   :  { %vm65_vm5 = vcmp.eq.f32.partialorder %v62_v27, %v64_v29  ;;  %v70_v32 = vcvt.f32.s32 %v64_v29 }
 0x2f6   :  { %v66_v31 = vsel %vm65_vm5, %v61_v30, inf }
 0x2f7   :  { %67 = vmin.xlane.f32.xlu1 %v66_v31  ;;  %v71_v34 = vshll.u32 %v70_v32, 16 }
 0x384   :  { %v68_v33 = vpop.xlane.xlu1 %67 }
 0x385   :  { %v69_v35 = vcvt.f32.s32 %v68_v33 }
 0x387   :  { %v72_v36 = vadd.s32 %v71_v34, %v69_v35 }
 0x389   :  { %v74_v37 = vsel %vm73_vm6, %v50_v20, %v72_v36 }
 0x38a   :  { %76 = vst.msk [vmem:[#allocation5] sm:$0x3] %vm75_vm7, %v74_v37 }
 0x38b   :  { %127 = shalt.err (!%p124_p12)
}
 0x38c   :  { %s128_s26 = scalar_lea.hbm %s192_s2, 32 }
 0x38d   :  { %p129_p13 = scmp.ne.s32.totalorder %s192_s2, %s128_s26  ;;  %p132_p0 = scmp.lt.u32.totalorder %s128_s26, %s192_s2 }
 0x38f   :  { %p134_p1 = pnand %p132_p0, %p129_p13 }
 0x391   :  { %137 = shalt.err (!%p134_p1)
}
 0x392   :  { %86 = dma.vmem_to_hbm [thread:$0]  %s84_s1, 32, %s192_s2, [#allocation4]  }
 0x393   :  { %140 = dma.done.wait [#allocation4], 32  }
 0x394   :  { %141 = vsyncadd [#allocation4], 4294967264 }
 0x395   :  { %90 = vsyncpa [#allocation3], 1 }
 0x396   :  { %91 = vsyncpa [#allocation4], 1 }

</bundles_post_ra>
